<compile_context>
chip_gen: v7x
topology: tpu7x:2x2x1
jax: 0.10.0
libtpu: 0.0.40
codegen_flags: <defaults>
</compile_context>

<pallas_src>
import functools

import jax
import jax.numpy as jnp
from jax.experimental import pallas as pl
from jax.experimental.pallas import tpu as pltpu

IN_DIM = 99
HID_DIM = 10
OUT_DIM = 2


def mlp_kernel(x_ref, w1_ref, b1_ref, w2_ref, b2_ref, o_ref):
    # x:  (TB, 99) f32   w1: (99, 10) f32   b1: (1, 10) f32
    # w2: (10, 2)  f32   b2: (1, 2)  f32    o:  (TB, 2) f32
    x = x_ref[...]
    h = jnp.dot(x, w1_ref[...], preferred_element_type=jnp.float32) + b1_ref[...]
    h = jnp.maximum(h, 0.0)  # ReLU
    out = jnp.dot(h, w2_ref[...], preferred_element_type=jnp.float32) + b2_ref[...]
    o_ref[...] = out.astype(o_ref.dtype)


@functools.partial(jax.jit, static_argnames=("tb",))
def mlp_forward(x, w1, b1, w2, b2, *, tb=8192):
    B, in_dim = x.shape
    out_dim = w2.shape[1]
    b1 = b1.reshape(1, -1)
    b2 = b2.reshape(1, -1)

    # Round the batch tile up to a sublane multiple (8 for f32) and cap it at
    # the rounded-up batch so the block is never larger than needed.
    tb = max(8, pl.cdiv(tb, 8) * 8)
    tb = min(tb, pl.cdiv(B, 8) * 8)

    grid = (pl.cdiv(B, tb),)  # last block may be partial; Pallas masks its stores

    cost = pl.CostEstimate(
        flops=2 * B * (in_dim * HID_DIM + HID_DIM * out_dim),
        transcendentals=0,
        bytes_accessed=(B * in_dim + B * out_dim
                        + w1.size + b1.size + w2.size + b2.size) * 4,
    )

    resident = lambda shape: pl.BlockSpec(shape, lambda i: (0, 0))

    return pl.pallas_call(
        mlp_kernel,
        out_shape=jax.ShapeDtypeStruct((B, out_dim), jnp.float32),
        grid=grid,
        in_specs=[
            pl.BlockSpec((tb, in_dim), lambda i: (i, 0)),  # x: tiled over batch
            resident(w1.shape),                            # weights stay in VMEM
            resident(b1.shape),
            resident(w2.shape),
            resident(b2.shape),
        ],
        out_specs=pl.BlockSpec((tb, out_dim), lambda i: (i, 0)),
        compiler_params=pltpu.CompilerParams(
            dimension_semantics=("parallel",),   # megacore shard on v7x
            vmem_limit_bytes=48 << 20,           # headroom for tb=8192 on v5e/v6e/v7x
        ),
        cost_estimate=cost,
    )(x, w1, b1, w2, b2)


def init_params(key):
    """Deterministic init mimicking PyTorch nn.Linear default (uniform +-1/sqrt(fan_in))."""
    k1, k2, k3, k4 = jax.random.split(key, 4)
    lim1 = 1.0 / jnp.sqrt(IN_DIM)
    lim2 = 1.0 / jnp.sqrt(HID_DIM)
    w1 = jax.random.uniform(k1, (IN_DIM, HID_DIM), jnp.float32, -lim1, lim1)
    b1 = jax.random.uniform(k2, (1, HID_DIM), jnp.float32, -lim1, lim1)
    w2 = jax.random.uniform(k3, (HID_DIM, OUT_DIM), jnp.float32, -lim2, lim2)
    b2 = jax.random.uniform(k4, (1, OUT_DIM), jnp.float32, -lim2, lim2)
    return w1, b1, w2, b2


if __name__ == "__main__":
    key = jax.random.PRNGKey(0)
    kx, kp = jax.random.split(key)

    B = 8
    x = jax.random.normal(kx, (B, IN_DIM), jnp.float32)
    w1, b1, w2, b2 = init_params(kp)

    out = jax.block_until_ready(mlp_forward(x, w1, b1, w2, b2))
    assert out.shape == (B, OUT_DIM)

    ref = jnp.maximum(x @ w1 + b1, 0.0) @ w2 + b2
    assert jnp.allclose(out, ref, atol=1e-2, rtol=1e-2)

    # Exercise a non-tile-multiple batch + odd user tb (partial-block masking,
    # tile rounding). No wrapper padding is involved anymore.
    B2 = 37
    x2 = jax.random.normal(jax.random.PRNGKey(1), (B2, IN_DIM), jnp.float32)
    out2 = jax.block_until_ready(mlp_forward(x2, w1, b1, w2, b2, tb=20))
    ref2 = jnp.maximum(x2 @ w1 + b1, 0.0) @ w2 + b2
    assert out2.shape == (B2, OUT_DIM)
    assert jnp.allclose(out2, ref2, atol=1e-2, rtol=1e-2)

    print("KERNEL_OK")
</pallas_src>

<mosaic_0001>
module attributes {stable_mosaic.version = 11 : i64} {
  func.func @mlp_kernel(%arg0: i32, %arg1: memref<8x99xf32, #tpu.memory_space<vmem>>, %arg2: memref<99x10xf32, #tpu.memory_space<vmem>>, %arg3: memref<1x10xf32, #tpu.memory_space<vmem>>, %arg4: memref<10x2xf32, #tpu.memory_space<vmem>>, %arg5: memref<1x2xf32, #tpu.memory_space<vmem>>, %arg6: memref<8x2xf32, #tpu.memory_space<vmem>>) attributes {dimension_semantics = [#tpu.dimension_semantics<parallel>], iteration_bounds = array<i64: 1>, scalar_prefetch = 0 : i64, scratch_operands = 0 : i64, tpu.core_type = #tpu.core_type<tc>, window_params = [{transform_indices = @transform_0, window_bounds = array<i64: 8, 99>}, {pipeline_mode = #tpu.pipeline_mode<synchronous>, transform_indices = @transform_1, window_bounds = array<i64: 99, 10>}, {pipeline_mode = #tpu.pipeline_mode<synchronous>, transform_indices = @transform_2, window_bounds = array<i64: 1, 10>}, {pipeline_mode = #tpu.pipeline_mode<synchronous>, transform_indices = @transform_3, window_bounds = array<i64: 10, 2>}, {pipeline_mode = #tpu.pipeline_mode<synchronous>, transform_indices = @transform_4, window_bounds = array<i64: 1, 2>}, {transform_indices = @transform_5, window_bounds = array<i64: 8, 2>}]} {
    %c0 = arith.constant 0 : index
    %c0_0 = arith.constant 0 : index
    %0 = vector.load %arg1[%c0, %c0_0] : memref<8x99xf32, #tpu.memory_space<vmem>>, vector<8x99xf32>
    %c0_1 = arith.constant 0 : index
    %c0_2 = arith.constant 0 : index
    %1 = vector.load %arg2[%c0_1, %c0_2] : memref<99x10xf32, #tpu.memory_space<vmem>>, vector<99x10xf32>
    %cst = arith.constant dense<0.000000e+00> : vector<8x10xf32>
    %2 = tpu.matmul %0, %1, %cst {dimension_numbers = #tpu.dot_dimension_numbers<[1], [0], [0], [1], [0, 0, 1, 1], [], []>} : vector<8x99xf32>, vector<99x10xf32>, vector<8x10xf32> -> vector<8x10xf32>
    %c0_3 = arith.constant 0 : index
    %c0_4 = arith.constant 0 : index
    %3 = vector.load %arg3[%c0_3, %c0_4] : memref<1x10xf32, #tpu.memory_space<vmem>>, vector<1x10xf32>
    %4 = vector.broadcast %3 : vector<1x10xf32> to vector<8x10xf32>
    %5 = arith.addf %2, %4 : vector<8x10xf32>
    %cst_5 = arith.constant 0.000000e+00 : f32
    %6 = vector.broadcast %cst_5 : f32 to vector<8x10xf32>
    %7 = arith.maximumf %5, %6 : vector<8x10xf32>
    %c0_6 = arith.constant 0 : index
    %c0_7 = arith.constant 0 : index
    %8 = vector.load %arg4[%c0_6, %c0_7] : memref<10x2xf32, #tpu.memory_space<vmem>>, vector<10x2xf32>
    %cst_8 = arith.constant dense<0.000000e+00> : vector<8x2xf32>
    %9 = tpu.matmul %7, %8, %cst_8 {dimension_numbers = #tpu.dot_dimension_numbers<[1], [0], [0], [1], [0, 0, 1, 1], [], []>} : vector<8x10xf32>, vector<10x2xf32>, vector<8x2xf32> -> vector<8x2xf32>
    %c0_9 = arith.constant 0 : index
    %c0_10 = arith.constant 0 : index
    %10 = vector.load %arg5[%c0_9, %c0_10] : memref<1x2xf32, #tpu.memory_space<vmem>>, vector<1x2xf32>
    %11 = vector.broadcast %10 : vector<1x2xf32> to vector<8x2xf32>
    %12 = arith.addf %9, %11 : vector<8x2xf32>
    %c0_11 = arith.constant 0 : index
    %c0_12 = arith.constant 0 : index
    %13 = vector.load %arg6[%c0_11, %c0_12] : memref<8x2xf32, #tpu.memory_space<vmem>>, vector<8x2xf32>
    tpu.vector_store %arg6[%c0_11, %c0_12], %12 {strides = array<i32>} : memref<8x2xf32, #tpu.memory_space<vmem>>, vector<8x2xf32>,
    return
  }
  func.func @transform_0(%arg0: i32) -> (i32, i32) {
    %c0_i32 = arith.constant 0 : i32
    %c0_i32_0 = arith.constant 0 : i32
    return %arg0, %c0_i32 : i32, i32
  }
  func.func @transform_1(%arg0: i32) -> (i32, i32) {
    %c0_i32 = arith.constant 0 : i32
    %c0_i32_0 = arith.constant 0 : i32
    %c0_i32_1 = arith.constant 0 : i32
    return %c0_i32, %c0_i32_0 : i32, i32
  }
  func.func @transform_2(%arg0: i32) -> (i32, i32) {
    %c0_i32 = arith.constant 0 : i32
    %c0_i32_0 = arith.constant 0 : i32
    %c0_i32_1 = arith.constant 0 : i32
    return %c0_i32, %c0_i32_0 : i32, i32
  }
  func.func @transform_3(%arg0: i32) -> (i32, i32) {
    %c0_i32 = arith.constant 0 : i32
    %c0_i32_0 = arith.constant 0 : i32
    %c0_i32_1 = arith.constant 0 : i32
    return %c0_i32, %c0_i32_0 : i32, i32
  }
  func.func @transform_4(%arg0: i32) -> (i32, i32) {
    %c0_i32 = arith.constant 0 : i32
    %c0_i32_0 = arith.constant 0 : i32
    %c0_i32_1 = arith.constant 0 : i32
    return %c0_i32, %c0_i32_0 : i32, i32
  }
  func.func @transform_5(%arg0: i32) -> (i32, i32) {
    %c0_i32 = arith.constant 0 : i32
    %c0_i32_0 = arith.constant 0 : i32
    return %arg0, %c0_i32 : i32, i32
  }
}

</mosaic_0001>

<bundles_post_ra>
// kernel: mlp_forward.1
= control target key start
LH: loop header
LB: loop body
LE: loop exit
PB: predicated region body
PF: predicated region fallthrough
CT: control target
= control target key end

     0   :  { %v298_v0 = vmov 0.0|0.0   ;;  %vm299_vm0 = vmmov 0   ;;  %v300_v4 = vmov 0.0   ;;  %vm45_vm1 = vcmask 1042432   ;;  %s389_s1 = inlined_call_operand.vmem [shape: f32[99,10], index: 1, kind: input, shape index: {}]   ;;  %s390_s0 = inlined_call_operand.vmem [shape: f32[8,99], index: 0, kind: input, shape index: {}]   ;;  %s391_s3 = inlined_call_operand.vmem [shape: f32[10,2], index: 3, kind: input, shape index: {}]   ;;  %s392_s2 = inlined_call_operand.vmem [shape: f32[1,10], index: 2, kind: input, shape index: {}]   ;;  %s393_s4 = inlined_call_operand.vmem [shape: f32[1,2], index: 4, kind: input, shape index: {}]   ;;  %s394_s5 = inlined_call_operand.vmem [shape: f32[8,2], index: 5, kind: output, shape index: {}]  }
   0x1   :  { %272 = vmatprep.subr.bf16.mxu0 %v298_v0  ;;  %v21_v1 = vld [vmem:[%s389_s1] sm:$0xff]  ;;  %v22_v2 = vld [vmem:[%s389_s1 + $0x8] sm:$0xff]  ;;  %v23_v3 = vld [vmem:[%s389_s1 + $0x10] sm:$0xff]  ;;  %262 = vmatprep.mubr.msk.f32.mxu0 %vm299_vm0, %v300_v4  ;;  %vm41_vm2 = vcmask 809984   ;;  %vm133_vm3 = vcmask 1041408   ;;  %vm301_vm4 = vmmov 1  }
   0x2   :  { %v273_v5 = vpack.c.bf16 %v22_v2, %v21_v1  ;;  %v24_v6 = vld [vmem:[%s389_s1 + $0x18] sm:$0xff]  ;;  %290 = vmatprep.subr.bf16.mxu1 %v298_v0  ;;  %269 = vmatprep.mubr.msk.f32.mxu1 %vm299_vm0, %v300_v4  ;;  %v25_v8 = vld [vmem:[%s389_s1 + $0x20] sm:$0xff]  ;;  %v26_v9 = vld [vmem:[%s389_s1 + $0x28] sm:$0xff]  ;;  %vm129_vm6 = vcmask 80896   ;;  %vm207_vm7 = vcmask 15360  }
   0x3   :  { %v276_v7 = vpack.c.bf16 %v24_v6, %v23_v3  ;;  %v279_v10 = vpack.c.bf16 %v26_v9, %v25_v8  ;;  %v27_v11 = vld [vmem:[%s389_s1 + $0x30] sm:$0xff]  ;;  %v28_v12 = vld [vmem:[%s389_s1 + $0x38] sm:$0xff]  ;;  %v29_v14 = vld [vmem:[%s389_s1 + $0x40] sm:$0xff] }
   0x4   :  { %274 = vmatpush3.bf16.msra.mxu0 %v273_v5  ;;  %v282_v13 = vpack.c.bf16 %v28_v12, %v27_v11  ;;  %v30_v15 = vld [vmem:[%s389_s1 + $0x48] sm:$0xff]  ;;  %v31_v17 = vld [vmem:[%s389_s1 + $0x50] sm:$0xff]  ;;  %v32_v18 = vld [vmem:[%s389_s1 + $0x58] sm:$0xff] }
   0x5   :  { %275 = vmatprep.subr.bf16.mxu0 %v298_v0  ;;  %v285_v16 = vpack.c.bf16 %v30_v15, %v29_v14  ;;  %v288_v19 = vpack.c.bf16 %v32_v18, %v31_v17  ;;  %v33_v20 = vld [vmem:[%s389_s1 + $0x60] sm:$0x7]  ;;  %v121_v23 = vld [vmem:[%s391_s3 + $0x8] sm:$0x3]  ;;  %vm292_vm5 = vmpackc.low %vm133_vm3, %vm301_vm4 }
   0x6   :  { %v20_v21 = vld [vmem:[%s390_s0] sm:$0xff] }
   0x7   :  { %v120_v22 = vld [vmem:[%s391_s3] sm:$0xff] }
   0x8   :  { %277 = vmatpush3.bf16.msra.mxu0 %v276_v7  ;;  %v291_v24 = vpack.c.bf16 %v121_v23, %v120_v22  ;;  %v213_v25 = vld [vmem:[%s392_s2] ss:$0 sm:$0xff] }
   0x9   :  { %278 = vmatprep.subr.bf16.mxu0 %v298_v0  ;;  %v216_v30 = vld [vmem:[%s393_s4] ss:$0 sm:$0xff] }
   0xa   :  { %293 = vmatpush3.bf16.msk.msra.mxu1 %vm292_vm5, %v291_v24 }
   0xc   :  { %280 = vmatpush3.bf16.msra.mxu0 %v279_v10 }
   0xd   :  { %281 = vmatprep.subr.bf16.mxu0 %v298_v0 }
  0x10   :  { %283 = vmatpush3.bf16.msra.mxu0 %v282_v13 }
  0x11   :  { %284 = vmatprep.subr.bf16.mxu0 %v298_v0 }
  0x14   :  { %286 = vmatpush3.bf16.msra.mxu0 %v285_v16 }
  0x15   :  { %287 = vmatprep.subr.bf16.mxu0 %v298_v0 }
  0x18   :  { %289 = vmatpush3.bf16.msra.mxu0 %v288_v19 }
  0x19   :  { %260 = vmatprep.subr.mxu0 %v300_v4 }
  0x1c   :  { %261 = vmatpush3.msk.msra.mxu0 %vm45_vm1, %v33_v20 }
  0x1d   :  { %263 = vmatmul.mubr.msk.f32.vlgmr.msra.gmra.mrb[0].mxu0 %vm41_vm2, %v20_v21 }
  0xf0   :  { %v115_v26 = vpop.f32.mrb[0].mxu0 }
  0xf1   :  { %v116_v27 = vadd.f32 %v213_v25, %v115_v26  ;;  %v264_v28 = vpop.f32.mrb[1].mxu0 }
  0xf3   :  { %v119_v29 = vmax.f32 %v116_v27, 0.0 }
  0xf5   :  { %270 = vmatmul.mubr.msk.f32.vlgmr.msra.gmra.mrb[0].mxu1 %vm129_vm6, %v119_v29 }
 0x1c8   :  { %v203_v31 = vpop.f32.mrb[0].mxu1 }
 0x1c9   :  { %v204_v32 = vadd.f32 %v216_v30, %v203_v31  ;;  %v271_v33 = vpop.f32.mrb[1].mxu1 }
 0x1cb   :  { %208 = vst.msk [vmem:[%s394_s5] sm:$0xff] %vm207_vm7, %v204_v32 }

</bundles_post_ra>
